<compile_context>
chip_gen: v5e
topology: v5e:2x2
jax: 0.10.0
libtpu: 0.0.40
codegen_flags: <defaults>
</compile_context>

<pallas_src>
import functools

import jax
import jax.numpy as jnp
import numpy as np
from jax.experimental import pallas as pl
from jax.experimental.pallas import tpu as pltpu


def _round_up(x, m):
    return ((x + m - 1) // m) * m


def _vmem_capacity():
    try:
        return int(pltpu.get_tpu_info().vmem_capacity_bytes)
    except Exception:
        return 64 * 2**20          # conservative: v7x per-core VMEM


def _vmem_limit(per_step_bytes, capacity):
    limit = max(32 * 2**20, 2 * per_step_bytes)
    limit = min(limit, int(0.7 * capacity))
    return int(max(limit, per_step_bytes + (2 << 20)))


def _tn_candidates(ocp, cap=512):
    # multiples of 128 that divide OCp (OCp is itself a multiple of 128)
    cands = [c for c in range(128, ocp + 1, 128) if ocp % c == 0 and c <= cap]
    if not cands:
        cands = [128]
    return sorted(cands, reverse=True)


def _choose_tiles(m, k, ocp, y_bytes, budget):
    """Pick (tm, tn): MXU-friendly tm, lane-dense tn that divides OCp."""
    m8 = _round_up(max(m, 1), 8)
    tm = 256 if m8 >= 4 * 256 else 128   # small M -> 128 so grid has >=4 steps
    tm = min(tm, m8)
    tns = _tn_candidates(ocp)

    def need(tm_, tn_):
        # double-buffered LHS / RHS / output (+ stats / per-channel vectors)
        return 2 * (tm_ * k * 2 + k * tn_ * 2 + tm_ * tn_ * y_bytes
                    + 2 * 8 * tn_ * 4 + tn_ * 4)

    ti = 0
    while ti + 1 < len(tns) and need(tm, tns[ti]) > budget:
        ti += 1                           # shrink the OC tile first
    tn = tns[ti]
    while tm > 8 and need(tm, tn) > budget:
        tm = max(8, (tm // 2 // 8) * 8)   # last resort: shrink the M tile
    return tm, tn


# ----------------------------- Pallas kernels -----------------------------

def _conv_stats_kernel(p_ref, w_ref, y_ref, psum_ref, psq_ref):
    # p_ref: (tm, K) bf16   w_ref: (K, tn) bf16
    # y_ref: (tm, tn) bf16  psum_ref / psq_ref: (8, tn) f32
    acc = jnp.dot(p_ref[...], w_ref[...], preferred_element_type=jnp.float32)
    y_ref[...] = acc.astype(y_ref.dtype)
    # Padded patch rows are exact zeros -> contribute exactly 0; no mask.
    tm, tn = acc.shape
    a = acc.reshape(tm // 8, 8, tn)       # layout-preserving split of sublanes
    psum_ref[...] = jnp.sum(a, axis=0)    # strided VPU adds (no XLU reduce)
    psq_ref[...] = jnp.sum(a * a, axis=0)


def _conv_bias_relu_kernel(p_ref, w_ref, b_ref, o_ref):
    # bn=False path: conv + bias + ReLU fully fused, single HBM pass.
    acc = jnp.dot(p_ref[...], w_ref[...], preferred_element_type=jnp.float32)
    o_ref[...] = jnp.maximum(acc + b_ref[...], 0.0).astype(o_ref.dtype)


def _scale_shift_relu_kernel(y_ref, s_ref, t_ref, o_ref):
    # y_ref: (te, tn) bf16, s_ref / t_ref: (1, tn) f32 per-channel scale/shift
    y = y_ref[...].astype(jnp.float32)
    o_ref[...] = jnp.maximum(y * s_ref[...] + t_ref[...], 0.0)


# ------------------------------ host wrappers ------------------------------

def _conv_stats(patches, w_mat, *, tm, tn, capacity):
    """y(bf16) = patches @ w_mat, plus per-channel sum / sum-of-squares."""
    m_pad, k = patches.shape
    ocp = w_mat.shape[1]
    gm, gn = m_pad // tm, ocp // tn
    need = 2 * (tm * k * 2 + k * tn * 2 + tm * tn * 2 + 2 * 8 * tn * 4)

    y, psum, psq = pl.pallas_call(
        _conv_stats_kernel,
        out_shape=(
            jax.ShapeDtypeStruct((m_pad, ocp), jnp.bfloat16),
            jax.ShapeDtypeStruct((gm * 8, ocp), jnp.float32),
            jax.ShapeDtypeStruct((gm * 8, ocp), jnp.float32),
        ),
        grid_spec=pltpu.PrefetchScalarGridSpec(
            num_scalar_prefetch=0,
            grid=(gm, gn),
            in_specs=[
                pl.BlockSpec((tm, k), lambda i, j: (i, 0)),
                pl.BlockSpec((k, tn), lambda i, j: (0, j)),
            ],
            out_specs=[
                pl.BlockSpec((tm, tn), lambda i, j: (i, j)),
                pl.BlockSpec((8, tn), lambda i, j: (i, j)),
                pl.BlockSpec((8, tn), lambda i, j: (i, j)),
            ],
        ),
        compiler_params=pltpu.CompilerParams(
            dimension_semantics=("parallel", "parallel"),
            vmem_limit_bytes=_vmem_limit(need, capacity),
        ),
    )(patches, w_mat)

    sums = psum.reshape(gm, 8, ocp).sum(axis=(0, 1))
    sqs = psq.reshape(gm, 8, ocp).sum(axis=(0, 1))
    return y, sums, sqs


def _conv_bias_relu(patches, w_mat, bias_p, *, tm, tn, capacity):
    m_pad, k = patches.shape
    ocp = w_mat.shape[1]
    gm, gn = m_pad // tm, ocp // tn
    need = 2 * (tm * k * 2 + k * tn * 2 + tm * tn * 4 + tn * 4)
    return pl.pallas_call(
        _conv_bias_relu_kernel,
        out_shape=jax.ShapeDtypeStruct((m_pad, ocp), jnp.float32),
        grid_spec=pltpu.PrefetchScalarGridSpec(
            num_scalar_prefetch=0,
            grid=(gm, gn),
            in_specs=[
                pl.BlockSpec((tm, k), lambda i, j: (i, 0)),
                pl.BlockSpec((k, tn), lambda i, j: (0, j)),
                pl.BlockSpec((1, tn), lambda i, j: (0, j)),
            ],
            out_specs=pl.BlockSpec((tm, tn), lambda i, j: (i, j)),
        ),
        compiler_params=pltpu.CompilerParams(
            dimension_semantics=("parallel", "parallel"),
            vmem_limit_bytes=_vmem_limit(need, capacity),
        ),
    )(patches, w_mat, bias_p.reshape(1, ocp))


def _scale_shift_relu(y, scale, shift, *, tm, capacity):
    m_pad, ocp = y.shape
    # Epilogue is HBM-bound: use the largest row tile (<=1024) dividing m_pad.
    te = tm
    while te * 2 <= 1024 and m_pad % (te * 2) == 0:
        te *= 2
    tn = _tn_candidates(ocp)[0]
    gm, gn = m_pad // te, ocp // tn
    need = 2 * (te * tn * 2 + te * tn * 4 + 2 * tn * 4)
    return pl.pallas_call(
        _scale_shift_relu_kernel,
        out_shape=jax.ShapeDtypeStruct((m_pad, ocp), jnp.float32),
        grid_spec=pltpu.PrefetchScalarGridSpec(
            num_scalar_prefetch=0,
            grid=(gm, gn),
            in_specs=[
                pl.BlockSpec((te, tn), lambda i, j: (i, j)),
                pl.BlockSpec((1, tn), lambda i, j: (0, j)),
                pl.BlockSpec((1, tn), lambda i, j: (0, j)),
            ],
            out_specs=pl.BlockSpec((te, tn), lambda i, j: (i, j)),
        ),
        compiler_params=pltpu.CompilerParams(
            dimension_semantics=("parallel", "parallel"),
            vmem_limit_bytes=_vmem_limit(need, capacity),
        ),
    )(y, scale.reshape(1, ocp), shift.reshape(1, ocp))


@functools.partial(jax.jit, static_argnames=("stride", "padding", "bn"))
def conv_forward(x, weight, bias, gamma, beta, *, stride, padding, bn=True,
                 eps=1e-5):
    """Equivalent of Conv.forward:  Conv2d -> [BatchNorm2d] -> ReLU.

    x: [N, C, H, W], weight: [OC, C, KH, KW], bias/gamma/beta: [OC]
    returns [N, OC, OH, OW]  (NCHW, like PyTorch)
    """
    n, c, h, w = x.shape
    oc, _, kh, kw = weight.shape
    oh = (h + 2 * padding - kh) // stride + 1
    ow = (w + 2 * padding - kw) // stride + 1
    m = n * oh * ow
    k = kh * kw * c
    ocp = _round_up(oc, 128)                  # lane-dense output channels

    capacity = _vmem_capacity()
    y_bytes = 2 if bn else 4                  # bf16 intermediate when bn=True
    tm, tn = _choose_tiles(m, k, ocp, y_bytes, capacity // 2)
    m_pad = _round_up(m, tm)

    # im2col in bf16, NHWC, channel-minor K order (kh, kw, c): strided slabs
    # concatenated on the minor axis; M pad only if tm does not divide m.
    x_nhwc = jnp.transpose(x, (0, 2, 3, 1)).astype(jnp.bfloat16)
    xp = jnp.pad(x_nhwc, ((0, 0), (padding, padding), (padding, padding), (0, 0)))
    slabs = []
    for i in range(kh):
        for j in range(kw):
            slabs.append(xp[:, i:i + stride * oh:stride,
                            j:j + stride * ow:stride, :])
    patches = jnp.concatenate(slabs, axis=-1).reshape(m, k)
    if m_pad != m:
        patches = jnp.pad(patches, ((0, m_pad - m), (0, 0)))

    # weight [OC, C, KH, KW] -> [KH*KW*C, OCp] matching the (kh, kw, c) order.
    w_mat = jnp.transpose(weight, (2, 3, 1, 0)).reshape(k, oc).astype(jnp.bfloat16)
    if ocp != oc:
        w_mat = jnp.pad(w_mat, ((0, 0), (0, ocp - oc)))

    bias_p = jnp.pad(bias.astype(jnp.float32), (0, ocp - oc))

    if bn:
        # Bias is not added: it cancels in training-mode BatchNorm.
        y, sums, sqs = _conv_stats(patches, w_mat, tm=tm, tn=tn,
                                   capacity=capacity)
        gamma_p = jnp.pad(gamma.astype(jnp.float32), (0, ocp - oc))
        beta_p = jnp.pad(beta.astype(jnp.float32), (0, ocp - oc))
        mean = sums / m                       # biased batch statistics
        var = jnp.maximum(sqs / m - mean * mean, 0.0)
        scale = gamma_p * jax.lax.rsqrt(var + eps)
        shift = beta_p - mean * scale
        out = _scale_shift_relu(y, scale, shift, tm=tm, capacity=capacity)
    else:
        out = _conv_bias_relu(patches, w_mat, bias_p, tm=tm, tn=tn,
                              capacity=capacity)

    out = out[:m, :oc].reshape(n, oh, ow, oc)
    return jnp.transpose(out, (0, 3, 1, 2))   # -> NCHW (PyTorch layout)


# ------------------------------ reference / demo ------------------------------

def _reference(x, weight, bias, gamma, beta, stride, padding, bn=True, eps=1e-5):
    # Match the kernel's bf16 operand rounding (f32 accumulation on both sides).
    xr = x.astype(jnp.bfloat16).astype(jnp.float32)
    wr = weight.astype(jnp.bfloat16).astype(jnp.float32)
    y = jax.lax.conv_general_dilated(
        xr, wr, window_strides=(stride, stride),
        padding=[(padding, padding), (padding, padding)],
        dimension_numbers=("NCHW", "OIHW", "NCHW"),
        precision=jax.lax.Precision.HIGHEST,
    ) + bias.reshape(1, -1, 1, 1).astype(jnp.float32)
    if bn:
        mean = jnp.mean(y, axis=(0, 2, 3), keepdims=True)
        var = jnp.mean(jnp.square(y - mean), axis=(0, 2, 3), keepdims=True)
        y = (y - mean) / jnp.sqrt(var + eps) * gamma.reshape(1, -1, 1, 1) \
            + beta.reshape(1, -1, 1, 1)
    return jnp.maximum(y, 0.0)


if __name__ == "__main__":
    key = jax.random.PRNGKey(0)
    k_x, k_w, k_b = jax.random.split(key, 3)

    # Module config: Conv(in_ch=4, out_ch=8, kernel_size=3, stride=1, bn=True, padding=1)
    in_ch, out_ch, ksize, stride, padding = 4, 8, 3, 1, 1
    n, h, w = 2, 16, 16

    x = jax.random.normal(k_x, (n, in_ch, h, w), dtype=jnp.float32)
    fan_in = in_ch * ksize * ksize
    bound = 1.0 / np.sqrt(fan_in)
    weight = jax.random.uniform(k_w, (out_ch, in_ch, ksize, ksize),
                                minval=-bound, maxval=bound, dtype=jnp.float32)
    bias = jax.random.uniform(k_b, (out_ch,), minval=-bound, maxval=bound,
                              dtype=jnp.float32)
    gamma = jnp.ones((out_ch,), jnp.float32)   # PyTorch BatchNorm2d default init
    beta = jnp.zeros((out_ch,), jnp.float32)

    # bn=True path (module default).  Tolerance 1e-2 accounts for the bf16
    # storage of the pre-BN activation (<= 2^-9 relative) amplified by 1/std.
    out = jax.block_until_ready(conv_forward(
        x, weight, bias, gamma, beta, stride=stride, padding=padding, bn=True))
    ref = jax.block_until_ready(_reference(
        x, weight, bias, gamma, beta, stride, padding, bn=True))
    assert out.shape == (n, out_ch, h, w), out.shape
    np.testing.assert_allclose(np.asarray(out), np.asarray(ref),
                               rtol=1e-2, atol=1e-2)

    # bn=False path (Conv2d + ReLU only, fully fused — f32 output).
    out2 = jax.block_until_ready(conv_forward(
        x, weight, bias, gamma, beta, stride=stride, padding=padding, bn=False))
    ref2 = jax.block_until_ready(_reference(
        x, weight, bias, gamma, beta, stride, padding, bn=False))
    np.testing.assert_allclose(np.asarray(out2), np.asarray(ref2),
                               rtol=2e-3, atol=2e-3)

    print("KERNEL_OK")
</pallas_src>

<mosaic_0001>
module attributes {stable_mosaic.version = 11 : i64} {
  func.func @_conv_stats_kernel(%arg0: i32, %arg1: i32, %arg2: memref<128x36xbf16, #tpu.memory_space<vmem>>, %arg3: memref<36x128xbf16, #tpu.memory_space<vmem>>, %arg4: memref<128x128xbf16, #tpu.memory_space<vmem>>, %arg5: memref<8x128xf32, #tpu.memory_space<vmem>>, %arg6: memref<8x128xf32, #tpu.memory_space<vmem>>) attributes {dimension_semantics = [#tpu.dimension_semantics<parallel>, #tpu.dimension_semantics<parallel>], iteration_bounds = array<i64: 4, 1>, scalar_prefetch = 0 : i64, scratch_operands = 0 : i64, tpu.core_type = #tpu.core_type<tc>, window_params = [{transform_indices = @transform_0, window_bounds = array<i64: 128, 36>}, {transform_indices = @transform_1, window_bounds = array<i64: 36, 128>}, {transform_indices = @transform_2, window_bounds = array<i64: 128, 128>}, {transform_indices = @transform_3, window_bounds = array<i64: 8, 128>}, {transform_indices = @transform_4, window_bounds = array<i64: 8, 128>}]} {
    %c0 = arith.constant 0 : index
    %c0_0 = arith.constant 0 : index
    %0 = vector.load %arg2[%c0, %c0_0] : memref<128x36xbf16, #tpu.memory_space<vmem>>, vector<128x36xbf16>
    %c0_1 = arith.constant 0 : index
    %c0_2 = arith.constant 0 : index
    %1 = vector.load %arg3[%c0_1, %c0_2] : memref<36x128xbf16, #tpu.memory_space<vmem>>, vector<36x128xbf16>
    %cst = arith.constant dense<0.000000e+00> : vector<128x128xf32>
    %2 = tpu.matmul %0, %1, %cst {dimension_numbers = #tpu.dot_dimension_numbers<[1], [0], [0], [1], [0, 0, 1, 1], [], []>} : vector<128x36xbf16>, vector<36x128xbf16>, vector<128x128xf32> -> vector<128x128xf32>
    %3 = arith.truncf %2 : vector<128x128xf32> to vector<128x128xbf16>
    %c0_3 = arith.constant 0 : index
    %c0_4 = arith.constant 0 : index
    %4 = vector.load %arg4[%c0_3, %c0_4] : memref<128x128xbf16, #tpu.memory_space<vmem>>, vector<128x128xbf16>
    tpu.vector_store %arg4[%c0_3, %c0_4], %3 {strides = array<i32>} : memref<128x128xbf16, #tpu.memory_space<vmem>>, vector<128x128xbf16>,
    %5 = vector.shape_cast %2 : vector<128x128xf32> to vector<16x8x128xf32>
    %cst_5 = arith.constant dense<0.000000e+00> : vector<8x128xf32>
    %6 = vector.multi_reduction <add>, %5, %cst_5 [0] : vector<16x8x128xf32> to vector<8x128xf32>
    %c0_6 = arith.constant 0 : index
    %c0_7 = arith.constant 0 : index
    %7 = vector.load %arg5[%c0_6, %c0_7] : memref<8x128xf32, #tpu.memory_space<vmem>>, vector<8x128xf32>
    tpu.vector_store %arg5[%c0_6, %c0_7], %6 {strides = array<i32>} : memref<8x128xf32, #tpu.memory_space<vmem>>, vector<8x128xf32>,
    %8 = arith.mulf %5, %5 : vector<16x8x128xf32>
    %cst_8 = arith.constant dense<0.000000e+00> : vector<8x128xf32>
    %9 = vector.multi_reduction <add>, %8, %cst_8 [0] : vector<16x8x128xf32> to vector<8x128xf32>
    %c0_9 = arith.constant 0 : index
    %c0_10 = arith.constant 0 : index
    %10 = vector.load %arg6[%c0_9, %c0_10] : memref<8x128xf32, #tpu.memory_space<vmem>>, vector<8x128xf32>
    tpu.vector_store %arg6[%c0_9, %c0_10], %9 {strides = array<i32>} : memref<8x128xf32, #tpu.memory_space<vmem>>, vector<8x128xf32>,
    return
  }
  func.func @transform_0(%arg0: i32, %arg1: i32) -> (i32, i32) {
    %c0_i32 = arith.constant 0 : i32
    %c0_i32_0 = arith.constant 0 : i32
    return %arg0, %c0_i32 : i32, i32
  }
  func.func @transform_1(%arg0: i32, %arg1: i32) -> (i32, i32) {
    %c0_i32 = arith.constant 0 : i32
    %c0_i32_0 = arith.constant 0 : i32
    return %c0_i32, %arg1 : i32, i32
  }
  func.func @transform_2(%arg0: i32, %arg1: i32) -> (i32, i32) {
    %c0_i32 = arith.constant 0 : i32
    return %arg0, %arg1 : i32, i32
  }
  func.func @transform_3(%arg0: i32, %arg1: i32) -> (i32, i32) {
    %c0_i32 = arith.constant 0 : i32
    return %arg0, %arg1 : i32, i32
  }
  func.func @transform_4(%arg0: i32, %arg1: i32) -> (i32, i32) {
    %c0_i32 = arith.constant 0 : i32
    return %arg0, %arg1 : i32, i32
  }
}

module attributes {stable_mosaic.version = 11 : i64} {
  func.func @_scale_shift_relu_kernel(%arg0: i32, %arg1: i32, %arg2: memref<512x128xbf16, #tpu.memory_space<vmem>>, %arg3: memref<1x128xf32, #tpu.memory_space<vmem>>, %arg4: memref<1x128xf32, #tpu.memory_space<vmem>>, %arg5: memref<512x128xf32, #tpu.memory_space<vmem>>) attributes {dimension_semantics = [#tpu.dimension_semantics<parallel>, #tpu.dimension_semantics<parallel>], iteration_bounds = array<i64: 1, 1>, scalar_prefetch = 0 : i64, scratch_operands = 0 : i64, tpu.core_type = #tpu.core_type<tc>, window_params = [{transform_indices = @transform_0, window_bounds = array<i64: 512, 128>}, {transform_indices = @transform_1, window_bounds = array<i64: 1, 128>}, {transform_indices = @transform_2, window_bounds = array<i64: 1, 128>}, {transform_indices = @transform_3, window_bounds = array<i64: 512, 128>}]} {
    %c0 = arith.constant 0 : index
    %c0_0 = arith.constant 0 : index
    %0 = vector.load %arg2[%c0, %c0_0] : memref<512x128xbf16, #tpu.memory_space<vmem>>, vector<512x128xbf16>
    %1 = arith.extf %0 : vector<512x128xbf16> to vector<512x128xf32>
    %c0_1 = arith.constant 0 : index
    %c0_2 = arith.constant 0 : index
    %2 = vector.load %arg3[%c0_1, %c0_2] : memref<1x128xf32, #tpu.memory_space<vmem>>, vector<1x128xf32>
    %3 = vector.broadcast %2 : vector<1x128xf32> to vector<512x128xf32>
    %4 = arith.mulf %1, %3 : vector<512x128xf32>
    %c0_3 = arith.constant 0 : index
    %c0_4 = arith.constant 0 : index
    %5 = vector.load %arg4[%c0_3, %c0_4] : memref<1x128xf32, #tpu.memory_space<vmem>>, vector<1x128xf32>
    %6 = vector.broadcast %5 : vector<1x128xf32> to vector<512x128xf32>
    %7 = arith.addf %4, %6 : vector<512x128xf32>
    %cst = arith.constant 0.000000e+00 : f32
    %8 = vector.broadcast %cst : f32 to vector<512x128xf32>
    %9 = arith.maximumf %7, %8 : vector<512x128xf32>
    %c0_5 = arith.constant 0 : index
    %c0_6 = arith.constant 0 : index
    %10 = vector.load %arg5[%c0_5, %c0_6] : memref<512x128xf32, #tpu.memory_space<vmem>>, vector<512x128xf32>
    tpu.vector_store %arg5[%c0_5, %c0_6], %9 {strides = array<i32>} : memref<512x128xf32, #tpu.memory_space<vmem>>, vector<512x128xf32>,
    return
  }
  func.func @transform_0(%arg0: i32, %arg1: i32) -> (i32, i32) {
    %c0_i32 = arith.constant 0 : i32
    return %arg0, %arg1 : i32, i32
  }
  func.func @transform_1(%arg0: i32, %arg1: i32) -> (i32, i32) {
    %c0_i32 = arith.constant 0 : i32
    %c0_i32_0 = arith.constant 0 : i32
    return %c0_i32, %arg1 : i32, i32
  }
  func.func @transform_2(%arg0: i32, %arg1: i32) -> (i32, i32) {
    %c0_i32 = arith.constant 0 : i32
    %c0_i32_0 = arith.constant 0 : i32
    return %c0_i32, %arg1 : i32, i32
  }
  func.func @transform_3(%arg0: i32, %arg1: i32) -> (i32, i32) {
    %c0_i32 = arith.constant 0 : i32
    return %arg0, %arg1 : i32, i32
  }
}

</mosaic_0001>

<bundles_post_ra>
// kernel: conv_forward.3
= control target key start
LH: loop header
LB: loop body
LE: loop exit
PB: predicated region body
PF: predicated region fallthrough
CT: control target
= control target key end

     0   :  { %s1017_s0 = inlined_call_operand.vmem [shape: bf16[512,128], index: 0, kind: input, shape index: {}]   ;;  %s1018_s1 = inlined_call_operand.vmem [shape: f32[1,128], index: 1, kind: input, shape index: {}]   ;;  %s1019_s2 = inlined_call_operand.vmem [shape: f32[1,128], index: 2, kind: input, shape index: {}]   ;;  %s1020_s3 = inlined_call_operand.vmem [shape: f32[512,128], index: 3, kind: output, shape index: {}]  }
   0x1   :  { %v411_v0 = vld [vmem:[%s1017_s0] sm:$0xff]   ;;  %v538_v5 = vld [vmem:[%s1017_s0 + $0x8] sm:$0xff]   ;;  %v539_v8 = vld [vmem:[%s1017_s0 + $0x10] sm:$0xff]  }
   0x2   :  { %v597_v1 = vld [vmem:[%s1018_s1] ss:$0 sm:$0xff]  ;;  %v412_v2 = vunpack.c.l.bf16 %v411_v0  ;;  %v413_v4 = vunpack.c.h.bf16 %v411_v0  ;;  %v416_v6 = vunpack.c.l.bf16 %v538_v5  ;;  %v417_v7 = vunpack.c.h.bf16 %v538_v5  ;;  %v540_v9 = vld [vmem:[%s1017_s0 + $0x18] sm:$0xff]   ;;  %v542_v31 = vld [vmem:[%s1017_s0 + $0x28] sm:$0xff]  }
   0x3   :  { %v602_v3 = vld [vmem:[%s1019_s2] ss:$0 sm:$0xff]  ;;  %v420_v12 = vunpack.c.l.bf16 %v539_v8  ;;  %v421_v13 = vunpack.c.h.bf16 %v539_v8  ;;  %v424_v16 = vunpack.c.l.bf16 %v540_v9  ;;  %v425_v17 = vunpack.c.h.bf16 %v540_v9  ;;  %v543_v36 = vld [vmem:[%s1017_s0 + $0x30] sm:$0xff]   ;;  %v544_v41 = vld [vmem:[%s1017_s0 + $0x38] sm:$0xff]  }
   0x4   :  { %v146_v10 = vmul.f32 %v597_v1, %v412_v2  ;;  %v147_v11 = vmul.f32 %v597_v1, %v413_v4  ;;  %v148_v14 = vmul.f32 %v597_v1, %v416_v6  ;;  %v149_v15 = vmul.f32 %v597_v1, %v417_v7  ;;  %v541_v26 = vld [vmem:[%s1017_s0 + $0x20] sm:$0xff]   ;;  %v546_v5 = vld [vmem:[%s1017_s0 + $0x48] sm:$0xff]  }
   0x5   :  { %v150_v20 = vmul.f32 %v597_v1, %v420_v12  ;;  %v151_v21 = vmul.f32 %v597_v1, %v421_v13  ;;  %v152_v24 = vmul.f32 %v597_v1, %v424_v16  ;;  %v153_v25 = vmul.f32 %v597_v1, %v425_v17  ;;  %v545_v62 = vld [vmem:[%s1017_s0 + $0x40] sm:$0xff]  }
   0x6   :  { %v214_v18 = vadd.f32 %v602_v3, %v146_v10  ;;  %v215_v19 = vadd.f32 %v602_v3, %v147_v11  ;;  %v216_v22 = vadd.f32 %v602_v3, %v148_v14  ;;  %v217_v23 = vadd.f32 %v602_v3, %v149_v15  ;;  %v547_v10 = vld [vmem:[%s1017_s0 + $0x50] sm:$0xff]   ;;  %v548_v15 = vld [vmem:[%s1017_s0 + $0x58] sm:$0xff]  }
   0x7   :  { %v218_v29 = vadd.f32 %v602_v3, %v150_v20  ;;  %v219_v30 = vadd.f32 %v602_v3, %v151_v21  ;;  %v220_v34 = vadd.f32 %v602_v3, %v152_v24  ;;  %v221_v35 = vadd.f32 %v602_v3, %v153_v25 }
   0x8   :  { %v278_v27 = vmax.f32 %v214_v18, 0.0  ;;  %v279_v28 = vmax.f32 %v215_v19, 0.0  ;;  %v280_v32 = vmax.f32 %v216_v22, 0.0  ;;  %v281_v33 = vmax.f32 %v217_v23, 0.0 }
   0x9   :  { %v282_v37 = vmax.f32 %v218_v29, 0.0  ;;  %v283_v38 = vmax.f32 %v219_v30, 0.0  ;;  %v428_v39 = vunpack.c.l.bf16 %v541_v26  ;;  %v429_v40 = vunpack.c.h.bf16 %v541_v26 }
   0xa   :  { %342 = vst [vmem:[%s1020_s3] sm:$0xff] %v278_v27  ;;  %v284_v42 = vmax.f32 %v220_v34, 0.0  ;;  %v285_v43 = vmax.f32 %v221_v35, 0.0  ;;  %v432_v44 = vunpack.c.l.bf16 %v542_v31  ;;  %v433_v45 = vunpack.c.h.bf16 %v542_v31 }
   0xb   :  { %343 = vst [vmem:[%s1020_s3 + $0x8] sm:$0xff] %v279_v28  ;;  %v154_v46 = vmul.f32 %v597_v1, %v428_v39  ;;  %v155_v47 = vmul.f32 %v597_v1, %v429_v40  ;;  %v436_v48 = vunpack.c.l.bf16 %v543_v36  ;;  %v437_v49 = vunpack.c.h.bf16 %v543_v36  ;;  %v549_v36 = vld [vmem:[%s1017_s0 + $0x60] sm:$0xff]  }
   0xc   :  { %344 = vst [vmem:[%s1020_s3 + $0x10] sm:$0xff] %v280_v32  ;;  %v156_v50 = vmul.f32 %v597_v1, %v432_v44  ;;  %v157_v51 = vmul.f32 %v597_v1, %v433_v45  ;;  %v440_v52 = vunpack.c.l.bf16 %v544_v41  ;;  %v441_v53 = vunpack.c.h.bf16 %v544_v41  ;;  %v550_v41 = vld [vmem:[%s1017_s0 + $0x68] sm:$0xff]  }
   0xd   :  { %345 = vst [vmem:[%s1020_s3 + $0x18] sm:$0xff] %v281_v33  ;;  %v222_v54 = vadd.f32 %v602_v3, %v154_v46  ;;  %v223_v55 = vadd.f32 %v602_v3, %v155_v47  ;;  %v158_v56 = vmul.f32 %v597_v1, %v436_v48  ;;  %v159_v57 = vmul.f32 %v597_v1, %v437_v49  ;;  %v551_v46 = vld [vmem:[%s1017_s0 + $0x70] sm:$0xff]  }
   0xe   :  { %346 = vst [vmem:[%s1020_s3 + $0x20] sm:$0xff] %v282_v37  ;;  %v224_v58 = vadd.f32 %v602_v3, %v156_v50  ;;  %v225_v59 = vadd.f32 %v602_v3, %v157_v51  ;;  %v160_v60 = vmul.f32 %v597_v1, %v440_v52  ;;  %v161_v61 = vmul.f32 %v597_v1, %v441_v53  ;;  %v552_v51 = vld [vmem:[%s1017_s0 + $0x78] sm:$0xff]  }
   0xf   :  { %347 = vst [vmem:[%s1020_s3 + $0x28] sm:$0xff] %v283_v38  ;;  %v286_v63 = vmax.f32 %v222_v54, 0.0  ;;  %v287_v0 = vmax.f32 %v223_v55, 0.0  ;;  %v226_v2 = vadd.f32 %v602_v3, %v158_v56  ;;  %v227_v4 = vadd.f32 %v602_v3, %v159_v57 }
  0x10   :  { %348 = vst [vmem:[%s1020_s3 + $0x30] sm:$0xff] %v284_v42  ;;  %v288_v6 = vmax.f32 %v224_v58, 0.0  ;;  %v289_v7 = vmax.f32 %v225_v59, 0.0  ;;  %v228_v8 = vadd.f32 %v602_v3, %v160_v60  ;;  %v229_v9 = vadd.f32 %v602_v3, %v161_v61 }
  0x11   :  { %349 = vst [vmem:[%s1020_s3 + $0x38] sm:$0xff] %v285_v43  ;;  %v290_v11 = vmax.f32 %v226_v2, 0.0  ;;  %v291_v12 = vmax.f32 %v227_v4, 0.0  ;;  %v444_v13 = vunpack.c.l.bf16 %v545_v62  ;;  %v445_v14 = vunpack.c.h.bf16 %v545_v62 }
  0x12   :  { %350 = vst [vmem:[%s1020_s3 + $0x40] sm:$0xff] %v286_v63  ;;  %v292_v16 = vmax.f32 %v228_v8, 0.0  ;;  %v293_v17 = vmax.f32 %v229_v9, 0.0  ;;  %v448_v18 = vunpack.c.l.bf16 %v546_v5  ;;  %v449_v19 = vunpack.c.h.bf16 %v546_v5 }
  0x13   :  { %351 = vst [vmem:[%s1020_s3 + $0x48] sm:$0xff] %v287_v0  ;;  %v162_v20 = vmul.f32 %v597_v1, %v444_v13  ;;  %v163_v21 = vmul.f32 %v597_v1, %v445_v14  ;;  %v452_v22 = vunpack.c.l.bf16 %v547_v10  ;;  %v453_v23 = vunpack.c.h.bf16 %v547_v10  ;;  %v553_v10 = vld [vmem:[%s1017_s0 + $0x80] sm:$0xff]  }
  0x14   :  { %352 = vst [vmem:[%s1020_s3 + $0x50] sm:$0xff] %v288_v6  ;;  %v164_v24 = vmul.f32 %v597_v1, %v448_v18  ;;  %v165_v25 = vmul.f32 %v597_v1, %v449_v19  ;;  %v456_v26 = vunpack.c.l.bf16 %v548_v15  ;;  %v457_v27 = vunpack.c.h.bf16 %v548_v15  ;;  %v554_v15 = vld [vmem:[%s1017_s0 + $0x88] sm:$0xff]  }
  0x15   :  { %353 = vst [vmem:[%s1020_s3 + $0x58] sm:$0xff] %v289_v7  ;;  %v230_v28 = vadd.f32 %v602_v3, %v162_v20  ;;  %v231_v29 = vadd.f32 %v602_v3, %v163_v21  ;;  %v166_v30 = vmul.f32 %v597_v1, %v452_v22  ;;  %v167_v31 = vmul.f32 %v597_v1, %v453_v23  ;;  %v555_v20 = vld [vmem:[%s1017_s0 + $0x90] sm:$0xff]  }
  0x16   :  { %354 = vst [vmem:[%s1020_s3 + $0x60] sm:$0xff] %v290_v11  ;;  %v232_v32 = vadd.f32 %v602_v3, %v164_v24  ;;  %v233_v33 = vadd.f32 %v602_v3, %v165_v25  ;;  %v168_v34 = vmul.f32 %v597_v1, %v456_v26  ;;  %v169_v35 = vmul.f32 %v597_v1, %v457_v27  ;;  %v556_v25 = vld [vmem:[%s1017_s0 + $0x98] sm:$0xff]  }
  0x17   :  { %355 = vst [vmem:[%s1020_s3 + $0x68] sm:$0xff] %v291_v12  ;;  %v294_v37 = vmax.f32 %v230_v28, 0.0  ;;  %v295_v38 = vmax.f32 %v231_v29, 0.0  ;;  %v234_v39 = vadd.f32 %v602_v3, %v166_v30  ;;  %v235_v40 = vadd.f32 %v602_v3, %v167_v31 }
  0x18   :  { %356 = vst [vmem:[%s1020_s3 + $0x70] sm:$0xff] %v292_v16  ;;  %v296_v42 = vmax.f32 %v232_v32, 0.0  ;;  %v297_v43 = vmax.f32 %v233_v33, 0.0  ;;  %v236_v44 = vadd.f32 %v602_v3, %v168_v34  ;;  %v237_v45 = vadd.f32 %v602_v3, %v169_v35 }
  0x19   :  { %357 = vst [vmem:[%s1020_s3 + $0x78] sm:$0xff] %v293_v17  ;;  %v298_v47 = vmax.f32 %v234_v39, 0.0  ;;  %v299_v48 = vmax.f32 %v235_v40, 0.0  ;;  %v460_v49 = vunpack.c.l.bf16 %v549_v36  ;;  %v461_v50 = vunpack.c.h.bf16 %v549_v36 }
  0x1a   :  { %358 = vst [vmem:[%s1020_s3 + $0x80] sm:$0xff] %v294_v37  ;;  %v300_v52 = vmax.f32 %v236_v44, 0.0  ;;  %v301_v53 = vmax.f32 %v237_v45, 0.0  ;;  %v464_v54 = vunpack.c.l.bf16 %v550_v41  ;;  %v465_v55 = vunpack.c.h.bf16 %v550_v41 }
  0x1b   :  { %359 = vst [vmem:[%s1020_s3 + $0x88] sm:$0xff] %v295_v38  ;;  %v170_v56 = vmul.f32 %v597_v1, %v460_v49  ;;  %v171_v57 = vmul.f32 %v597_v1, %v461_v50  ;;  %v468_v58 = vunpack.c.l.bf16 %v551_v46  ;;  %v469_v59 = vunpack.c.h.bf16 %v551_v46  ;;  %v557_v46 = vld [vmem:[%s1017_s0 + $0xa0] sm:$0xff]  }
  0x1c   :  { %360 = vst [vmem:[%s1020_s3 + $0x90] sm:$0xff] %v296_v42  ;;  %v172_v60 = vmul.f32 %v597_v1, %v464_v54  ;;  %v173_v61 = vmul.f32 %v597_v1, %v465_v55  ;;  %v472_v62 = vunpack.c.l.bf16 %v552_v51  ;;  %v473_v63 = vunpack.c.h.bf16 %v552_v51  ;;  %v558_v51 = vld [vmem:[%s1017_s0 + $0xa8] sm:$0xff]  }
  0x1d   :  { %361 = vst [vmem:[%s1020_s3 + $0x98] sm:$0xff] %v297_v43  ;;  %v238_v0 = vadd.f32 %v602_v3, %v170_v56  ;;  %v239_v2 = vadd.f32 %v602_v3, %v171_v57  ;;  %v174_v4 = vmul.f32 %v597_v1, %v468_v58  ;;  %v175_v5 = vmul.f32 %v597_v1, %v469_v59  ;;  %v559_v56 = vld [vmem:[%s1017_s0 + $0xb0] sm:$0xff]  }
  0x1e   :  { %362 = vst [vmem:[%s1020_s3 + $0xa0] sm:$0xff] %v298_v47  ;;  %v240_v6 = vadd.f32 %v602_v3, %v172_v60  ;;  %v241_v7 = vadd.f32 %v602_v3, %v173_v61  ;;  %v176_v8 = vmul.f32 %v597_v1, %v472_v62  ;;  %v177_v9 = vmul.f32 %v597_v1, %v473_v63  ;;  %v560_v61 = vld [vmem:[%s1017_s0 + $0xb8] sm:$0xff]  }
  0x1f   :  { %363 = vst [vmem:[%s1020_s3 + $0xa8] sm:$0xff] %v299_v48  ;;  %v302_v11 = vmax.f32 %v238_v0, 0.0  ;;  %v303_v12 = vmax.f32 %v239_v2, 0.0  ;;  %v242_v13 = vadd.f32 %v602_v3, %v174_v4  ;;  %v243_v14 = vadd.f32 %v602_v3, %v175_v5 }
  0x20   :  { %364 = vst [vmem:[%s1020_s3 + $0xb0] sm:$0xff] %v300_v52  ;;  %v304_v16 = vmax.f32 %v240_v6, 0.0  ;;  %v305_v17 = vmax.f32 %v241_v7, 0.0  ;;  %v244_v18 = vadd.f32 %v602_v3, %v176_v8  ;;  %v245_v19 = vadd.f32 %v602_v3, %v177_v9 }
  0x21   :  { %365 = vst [vmem:[%s1020_s3 + $0xb8] sm:$0xff] %v301_v53  ;;  %v306_v21 = vmax.f32 %v242_v13, 0.0  ;;  %v307_v22 = vmax.f32 %v243_v14, 0.0  ;;  %v476_v23 = vunpack.c.l.bf16 %v553_v10  ;;  %v477_v24 = vunpack.c.h.bf16 %v553_v10 }
  0x22   :  { %366 = vst [vmem:[%s1020_s3 + $0xc0] sm:$0xff] %v302_v11  ;;  %v308_v26 = vmax.f32 %v244_v18, 0.0  ;;  %v309_v27 = vmax.f32 %v245_v19, 0.0  ;;  %v480_v28 = vunpack.c.l.bf16 %v554_v15  ;;  %v481_v29 = vunpack.c.h.bf16 %v554_v15 }
  0x23   :  { %367 = vst [vmem:[%s1020_s3 + $0xc8] sm:$0xff] %v303_v12  ;;  %v178_v30 = vmul.f32 %v597_v1, %v476_v23  ;;  %v179_v31 = vmul.f32 %v597_v1, %v477_v24  ;;  %v484_v32 = vunpack.c.l.bf16 %v555_v20  ;;  %v485_v33 = vunpack.c.h.bf16 %v555_v20  ;;  %v561_v20 = vld [vmem:[%s1017_s0 + $0xc0] sm:$0xff]  }
  0x24   :  { %368 = vst [vmem:[%s1020_s3 + $0xd0] sm:$0xff] %v304_v16  ;;  %v180_v34 = vmul.f32 %v597_v1, %v480_v28  ;;  %v181_v35 = vmul.f32 %v597_v1, %v481_v29  ;;  %v488_v36 = vunpack.c.l.bf16 %v556_v25  ;;  %v489_v37 = vunpack.c.h.bf16 %v556_v25  ;;  %v562_v25 = vld [vmem:[%s1017_s0 + $0xc8] sm:$0xff]  }
  0x25   :  { %369 = vst [vmem:[%s1020_s3 + $0xd8] sm:$0xff] %v305_v17  ;;  %v246_v38 = vadd.f32 %v602_v3, %v178_v30  ;;  %v247_v39 = vadd.f32 %v602_v3, %v179_v31  ;;  %v182_v40 = vmul.f32 %v597_v1, %v484_v32  ;;  %v183_v41 = vmul.f32 %v597_v1, %v485_v33  ;;  %v563_v30 = vld [vmem:[%s1017_s0 + $0xd0] sm:$0xff]  }
  0x26   :  { %370 = vst [vmem:[%s1020_s3 + $0xe0] sm:$0xff] %v306_v21  ;;  %v248_v42 = vadd.f32 %v602_v3, %v180_v34  ;;  %v249_v43 = vadd.f32 %v602_v3, %v181_v35  ;;  %v184_v44 = vmul.f32 %v597_v1, %v488_v36  ;;  %v185_v45 = vmul.f32 %v597_v1, %v489_v37  ;;  %v564_v35 = vld [vmem:[%s1017_s0 + $0xd8] sm:$0xff]  }
  0x27   :  { %371 = vst [vmem:[%s1020_s3 + $0xe8] sm:$0xff] %v307_v22  ;;  %v310_v47 = vmax.f32 %v246_v38, 0.0  ;;  %v311_v48 = vmax.f32 %v247_v39, 0.0  ;;  %v250_v49 = vadd.f32 %v602_v3, %v182_v40  ;;  %v251_v50 = vadd.f32 %v602_v3, %v183_v41 }
  0x28   :  { %372 = vst [vmem:[%s1020_s3 + $0xf0] sm:$0xff] %v308_v26  ;;  %v312_v52 = vmax.f32 %v248_v42, 0.0  ;;  %v313_v53 = vmax.f32 %v249_v43, 0.0  ;;  %v252_v54 = vadd.f32 %v602_v3, %v184_v44  ;;  %v253_v55 = vadd.f32 %v602_v3, %v185_v45 }
  0x29   :  { %373 = vst [vmem:[%s1020_s3 + $0xf8] sm:$0xff] %v309_v27  ;;  %v314_v57 = vmax.f32 %v250_v49, 0.0  ;;  %v315_v58 = vmax.f32 %v251_v50, 0.0  ;;  %v492_v59 = vunpack.c.l.bf16 %v557_v46  ;;  %v493_v60 = vunpack.c.h.bf16 %v557_v46 }
  0x2a   :  { %374 = vst [vmem:[%s1020_s3 + $0x100] sm:$0xff] %v310_v47  ;;  %v316_v62 = vmax.f32 %v252_v54, 0.0  ;;  %v317_v63 = vmax.f32 %v253_v55, 0.0  ;;  %v496_v0 = vunpack.c.l.bf16 %v558_v51  ;;  %v497_v2 = vunpack.c.h.bf16 %v558_v51 }
  0x2b   :  { %375 = vst [vmem:[%s1020_s3 + $0x108] sm:$0xff] %v311_v48  ;;  %v186_v4 = vmul.f32 %v597_v1, %v492_v59  ;;  %v187_v5 = vmul.f32 %v597_v1, %v493_v60  ;;  %v500_v6 = vunpack.c.l.bf16 %v559_v56  ;;  %v501_v7 = vunpack.c.h.bf16 %v559_v56  ;;  %v565_v56 = vld [vmem:[%s1017_s0 + $0xe0] sm:$0xff]  }
  0x2c   :  { %376 = vst [vmem:[%s1020_s3 + $0x110] sm:$0xff] %v312_v52  ;;  %v188_v8 = vmul.f32 %v597_v1, %v496_v0  ;;  %v189_v9 = vmul.f32 %v597_v1, %v497_v2  ;;  %v504_v10 = vunpack.c.l.bf16 %v560_v61  ;;  %v505_v11 = vunpack.c.h.bf16 %v560_v61  ;;  %v566_v61 = vld [vmem:[%s1017_s0 + $0xe8] sm:$0xff]  }
  0x2d   :  { %377 = vst [vmem:[%s1020_s3 + $0x118] sm:$0xff] %v313_v53  ;;  %v254_v12 = vadd.f32 %v602_v3, %v186_v4  ;;  %v255_v13 = vadd.f32 %v602_v3, %v187_v5  ;;  %v190_v14 = vmul.f32 %v597_v1, %v500_v6  ;;  %v191_v15 = vmul.f32 %v597_v1, %v501_v7  ;;  %v567_v4 = vld [vmem:[%s1017_s0 + $0xf0] sm:$0xff]  }
  0x2e   :  { %378 = vst [vmem:[%s1020_s3 + $0x120] sm:$0xff] %v314_v57  ;;  %v256_v16 = vadd.f32 %v602_v3, %v188_v8  ;;  %v257_v17 = vadd.f32 %v602_v3, %v189_v9  ;;  %v192_v18 = vmul.f32 %v597_v1, %v504_v10  ;;  %v193_v19 = vmul.f32 %v597_v1, %v505_v11  ;;  %v568_v9 = vld [vmem:[%s1017_s0 + $0xf8] sm:$0xff]  }
  0x2f   :  { %379 = vst [vmem:[%s1020_s3 + $0x128] sm:$0xff] %v315_v58  ;;  %v318_v21 = vmax.f32 %v254_v12, 0.0  ;;  %v319_v22 = vmax.f32 %v255_v13, 0.0  ;;  %v258_v23 = vadd.f32 %v602_v3, %v190_v14  ;;  %v259_v24 = vadd.f32 %v602_v3, %v191_v15 }
  0x30   :  { %380 = vst [vmem:[%s1020_s3 + $0x130] sm:$0xff] %v316_v62  ;;  %v320_v26 = vmax.f32 %v256_v16, 0.0  ;;  %v321_v27 = vmax.f32 %v257_v17, 0.0  ;;  %v260_v28 = vadd.f32 %v602_v3, %v192_v18  ;;  %v261_v29 = vadd.f32 %v602_v3, %v193_v19 }
  0x31   :  { %381 = vst [vmem:[%s1020_s3 + $0x138] sm:$0xff] %v317_v63  ;;  %v322_v31 = vmax.f32 %v258_v23, 0.0  ;;  %v323_v32 = vmax.f32 %v259_v24, 0.0  ;;  %v508_v33 = vunpack.c.l.bf16 %v561_v20  ;;  %v509_v34 = vunpack.c.h.bf16 %v561_v20 }
  0x32   :  { %382 = vst [vmem:[%s1020_s3 + $0x140] sm:$0xff] %v318_v21  ;;  %v324_v36 = vmax.f32 %v260_v28, 0.0  ;;  %v325_v37 = vmax.f32 %v261_v29, 0.0  ;;  %v512_v38 = vunpack.c.l.bf16 %v562_v25  ;;  %v513_v39 = vunpack.c.h.bf16 %v562_v25 }
  0x33   :  { %383 = vst [vmem:[%s1020_s3 + $0x148] sm:$0xff] %v319_v22  ;;  %v194_v40 = vmul.f32 %v597_v1, %v508_v33  ;;  %v195_v41 = vmul.f32 %v597_v1, %v509_v34  ;;  %v516_v42 = vunpack.c.l.bf16 %v563_v30  ;;  %v517_v43 = vunpack.c.h.bf16 %v563_v30 }
  0x34   :  { %384 = vst [vmem:[%s1020_s3 + $0x150] sm:$0xff] %v320_v26  ;;  %v196_v44 = vmul.f32 %v597_v1, %v512_v38  ;;  %v197_v45 = vmul.f32 %v597_v1, %v513_v39  ;;  %v520_v46 = vunpack.c.l.bf16 %v564_v35  ;;  %v521_v47 = vunpack.c.h.bf16 %v564_v35 }
  0x35   :  { %385 = vst [vmem:[%s1020_s3 + $0x158] sm:$0xff] %v321_v27  ;;  %v262_v48 = vadd.f32 %v602_v3, %v194_v40  ;;  %v263_v49 = vadd.f32 %v602_v3, %v195_v41  ;;  %v198_v50 = vmul.f32 %v597_v1, %v516_v42  ;;  %v199_v51 = vmul.f32 %v597_v1, %v517_v43 }
  0x36   :  { %386 = vst [vmem:[%s1020_s3 + $0x160] sm:$0xff] %v322_v31  ;;  %v264_v52 = vadd.f32 %v602_v3, %v196_v44  ;;  %v265_v53 = vadd.f32 %v602_v3, %v197_v45  ;;  %v200_v54 = vmul.f32 %v597_v1, %v520_v46  ;;  %v201_v55 = vmul.f32 %v597_v1, %v521_v47 }
  0x37   :  { %387 = vst [vmem:[%s1020_s3 + $0x168] sm:$0xff] %v323_v32  ;;  %v326_v57 = vmax.f32 %v262_v48, 0.0  ;;  %v327_v58 = vmax.f32 %v263_v49, 0.0  ;;  %v266_v59 = vadd.f32 %v602_v3, %v198_v50  ;;  %v267_v60 = vadd.f32 %v602_v3, %v199_v51 }
  0x38   :  { %388 = vst [vmem:[%s1020_s3 + $0x170] sm:$0xff] %v324_v36  ;;  %v328_v62 = vmax.f32 %v264_v52, 0.0  ;;  %v329_v63 = vmax.f32 %v265_v53, 0.0  ;;  %v268_v0 = vadd.f32 %v602_v3, %v200_v54  ;;  %v269_v2 = vadd.f32 %v602_v3, %v201_v55 }
  0x39   :  { %389 = vst [vmem:[%s1020_s3 + $0x178] sm:$0xff] %v325_v37  ;;  %v330_v5 = vmax.f32 %v266_v59, 0.0  ;;  %v331_v6 = vmax.f32 %v267_v60, 0.0  ;;  %v524_v7 = vunpack.c.l.bf16 %v565_v56  ;;  %v525_v8 = vunpack.c.h.bf16 %v565_v56 }
  0x3a   :  { %390 = vst [vmem:[%s1020_s3 + $0x180] sm:$0xff] %v326_v57  ;;  %v332_v10 = vmax.f32 %v268_v0, 0.0  ;;  %v333_v11 = vmax.f32 %v269_v2, 0.0  ;;  %v528_v12 = vunpack.c.l.bf16 %v566_v61  ;;  %v529_v13 = vunpack.c.h.bf16 %v566_v61 }
  0x3b   :  { %391 = vst [vmem:[%s1020_s3 + $0x188] sm:$0xff] %v327_v58  ;;  %v202_v14 = vmul.f32 %v597_v1, %v524_v7  ;;  %v203_v15 = vmul.f32 %v597_v1, %v525_v8  ;;  %v532_v16 = vunpack.c.l.bf16 %v567_v4  ;;  %v533_v17 = vunpack.c.h.bf16 %v567_v4 }
  0x3c   :  { %392 = vst [vmem:[%s1020_s3 + $0x190] sm:$0xff] %v328_v62  ;;  %v204_v18 = vmul.f32 %v597_v1, %v528_v12  ;;  %v205_v19 = vmul.f32 %v597_v1, %v529_v13  ;;  %v536_v20 = vunpack.c.l.bf16 %v568_v9  ;;  %v537_v21 = vunpack.c.h.bf16 %v568_v9 }
  0x3d   :  { %393 = vst [vmem:[%s1020_s3 + $0x198] sm:$0xff] %v329_v63  ;;  %v270_v22 = vadd.f32 %v602_v3, %v202_v14  ;;  %v271_v23 = vadd.f32 %v602_v3, %v203_v15  ;;  %v206_v24 = vmul.f32 %v597_v1, %v532_v16  ;;  %v207_v25 = vmul.f32 %v597_v1, %v533_v17 }
  0x3e   :  { %394 = vst [vmem:[%s1020_s3 + $0x1a0] sm:$0xff] %v330_v5  ;;  %v272_v26 = vadd.f32 %v602_v3, %v204_v18  ;;  %v273_v27 = vadd.f32 %v602_v3, %v205_v19  ;;  %v208_v28 = vmul.f32 %v597_v1, %v536_v20  ;;  %v209_v29 = vmul.f32 %v597_v1, %v537_v21 }
  0x3f   :  { %395 = vst [vmem:[%s1020_s3 + $0x1a8] sm:$0xff] %v331_v6  ;;  %v334_v30 = vmax.f32 %v270_v22, 0.0  ;;  %v335_v31 = vmax.f32 %v271_v23, 0.0  ;;  %v274_v32 = vadd.f32 %v602_v3, %v206_v24  ;;  %v275_v33 = vadd.f32 %v602_v3, %v207_v25 }
  0x40   :  { %396 = vst [vmem:[%s1020_s3 + $0x1b0] sm:$0xff] %v332_v10  ;;  %v336_v34 = vmax.f32 %v272_v26, 0.0  ;;  %v337_v35 = vmax.f32 %v273_v27, 0.0  ;;  %v276_v36 = vadd.f32 %v602_v3, %v208_v28  ;;  %v277_v1 = vadd.f32 %v602_v3, %v209_v29 }
  0x41   :  { %397 = vst [vmem:[%s1020_s3 + $0x1b8] sm:$0xff] %v333_v11  ;;  %v338_v37 = vmax.f32 %v274_v32, 0.0  ;;  %v339_v38 = vmax.f32 %v275_v33, 0.0 }
  0x42   :  { %398 = vst [vmem:[%s1020_s3 + $0x1c0] sm:$0xff] %v334_v30  ;;  %v340_v39 = vmax.f32 %v276_v36, 0.0  ;;  %v341_v3 = vmax.f32 %v277_v1, 0.0 }
  0x43   :  { %399 = vst [vmem:[%s1020_s3 + $0x1c8] sm:$0xff] %v335_v31 }
  0x44   :  { %400 = vst [vmem:[%s1020_s3 + $0x1d0] sm:$0xff] %v336_v34 }
  0x45   :  { %401 = vst [vmem:[%s1020_s3 + $0x1d8] sm:$0xff] %v337_v35 }
  0x46   :  { %402 = vst [vmem:[%s1020_s3 + $0x1e0] sm:$0xff] %v338_v37 }
  0x47   :  { %403 = vst [vmem:[%s1020_s3 + $0x1e8] sm:$0xff] %v339_v38 }
  0x48   :  { %404 = vst [vmem:[%s1020_s3 + $0x1f0] sm:$0xff] %v340_v39 }
  0x49   :  { %405 = vst [vmem:[%s1020_s3 + $0x1f8] sm:$0xff] %v341_v3 }

// kernel: conv_forward.2
= control target key start
LH: loop header
LB: loop body
LE: loop exit
PB: predicated region body
PF: predicated region fallthrough
CT: control target
= control target key end

     0   :  { %s883_s15 = smov 0   ;;  %s885_s16 = smov 0   ;;  %s967_s0 = inlined_call_operand.vmem [shape: bf16[512,36], index: 0, kind: input, shape index: {}]   ;;  %s968_s1 = inlined_call_operand.vmem [shape: bf16[36,128], index: 1, kind: input, shape index: {}]   ;;  %s969_s2 = inlined_call_operand.vmem [shape: bf16[512,128], index: 2, kind: output, shape index: {0}]   ;;  %s970_s3 = inlined_call_operand.vmem [shape: f32[32,128], index: 3, kind: output, shape index: {1}]   ;;  %s971_s4 = inlined_call_operand.vmem [shape: f32[32,128], index: 4, kind: output, shape index: {2}]  }
   0x1   :  { %s887_s17 = smov 0  }
   0x2 LB: > { %s27_s18 = sadd.s32 1, %s852_s16  ;;  %p687_p0 = scmp.ge.s32.totalorder %s856_s17, 1  ;;  %s856_s17 = sphi %s887_s17, %s15_s17   ;;  %s852_s16 = sphi %s885_s16, %s973_s16   ;;  %s848_s15 = sphi %s883_s15, %s972_s15  }
   0x3   : > { %p29_p1 = scmp.ge.s32.totalorder %s27_s18, 4  ;;  %p195_p2 = scmp.lt.s32.totalorder %s856_s17, 5 }
   0x5   : > { %s975_s18 = smov (%p29_p1, %s27_s18), 0  ;;  %p196_p3 = pnand %p687_p0, %p195_p2 }
   0x6   : > { %s688_s21 = sshll.u32 (!%p196_p3), %s848_s15, 4  ;;  %p261_p5 = scmp.lt.s32.totalorder (!%p196_p3), %s848_s15, 3 }
   0x7   : > { %199 = sbr.rel (%p196_p3) target bundleno = 208 (0xd0), region = 28  ;;  %p243_p4 = scmp.lt.s32.totalorder (!%p196_p3), %s688_s21, 63 }
   0xc   : > { %v296_v0 = vld [vmem:[%s968_s1 + $0x10] sm:$0x3]  ;;  %vm377_vm0 = vcmask 1041408   ;;  %s977_s21 = smov (!%p243_p4, %s688_s21), 63  ;;  %v753_v4 = vld [vmem:[%s968_s1 + $0x8] sm:$0xff]  ;;  %v752_v5 = vld [vmem:[%s968_s1] sm:$0xff] }
   0xd   : > { %v346_v1 = vunpack.c.l.b16 %v296_v0  ;;  %s689_s24 = sshll.u32 %s977_s21, 2  ;;  %vm352_vm1 = vcmask 293888   ;;  %s979_s15 = smov (!%p261_p5, %s848_s15), 3 }
   0xe   : > { %s246_s29 = scalar_lea.vmem %s967_s0, %s689_s24  ;;  %s936_s6 = scalar_lea.vmem %s969_s2, %s689_s24 }
   0xf   : > { %v349_v2 = vpack.c.b16 %v346_v1, %v346_v1  ;;  %v744_v6 = vld [vmem:[%s246_s29] sm:$0xff]  ;;  %v746_v7 = vld [vmem:[%s246_s29 + $0x10] sm:$0xff]  ;;  %v745_v10 = vld [vmem:[%s246_s29 + $0x8] sm:$0xff]  ;;  %s692_s7 = sshll.u32 %s979_s15, 3 }
  0x10   : > { %v748_v8 = vld [vmem:[%s246_s29 + $0x20] sm:$0xff]  ;;  %v750_v9 = vld [vmem:[%s246_s29 + $0x30] sm:$0xff]  ;;  %v747_v11 = vld [vmem:[%s246_s29 + $0x18] sm:$0xff]  ;;  %s267_s10 = scalar_lea.vmem %s970_s3, %s692_s7  ;;  %s274_s13 = scalar_lea.vmem %s971_s4, %s692_s7 }
  0x11   : > { %v379_v3 = vsel %vm377_vm0, %v349_v2, 0  ;;  %v749_v12 = vld [vmem:[%s246_s29 + $0x28] sm:$0xff]  ;;  %v751_v13 = vld [vmem:[%s246_s29 + $0x38] sm:$0xff] }
  0x12   : > { %386 = vmatpush.bf16.msra.mxu0 %v379_v3  ;;  %801 = vmatpush.bf16.msra.mxu1 %v379_v3 }
  0x13   : > { %802 = vmatpush.bf16.msra.mxu2 %v379_v3  ;;  %803 = vmatpush.bf16.msra.mxu3 %v379_v3 }
  0x16   : > { %387 = vmatpush.bf16.msra.mxu0 %v753_v4  ;;  %804 = vmatpush.bf16.msra.mxu1 %v753_v4 }
  0x17   : > { %805 = vmatpush.bf16.msra.mxu2 %v753_v4  ;;  %806 = vmatpush.bf16.msra.mxu3 %v753_v4 }
  0x1a   : > { %388 = vmatpush.bf16.msra.mxu0 %v752_v5  ;;  %807 = vmatpush.bf16.msra.mxu1 %v752_v5 }
  0x1b   : > { %808 = vmatpush.bf16.msra.mxu2 %v752_v5  ;;  %809 = vmatpush.bf16.msra.mxu3 %v752_v5 }
  0x1d   : > { %734 = vmatmul.msk.bf16.vlgmr.msra.gmra.mxu0 %vm352_vm1, %v744_v6  ;;  %736 = vmatmul.msk.bf16.vlgmr.msra.gmra.mxu1 %vm352_vm1, %v746_v7 }
  0x1e   : > { %738 = vmatmul.msk.bf16.vlgmr.msra.gmra.mxu2 %vm352_vm1, %v748_v8  ;;  %740 = vmatmul.msk.bf16.vlgmr.msra.gmra.mxu3 %vm352_vm1, %v750_v9 }
  0x2d   : > { %735 = vmatmul.msk.bf16.gmra.mxu0 %vm352_vm1, %v745_v10  ;;  %737 = vmatmul.msk.bf16.gmra.mxu1 %vm352_vm1, %v747_v11 }
  0x2e   : > { %739 = vmatmul.msk.bf16.gmra.mxu2 %vm352_vm1, %v749_v12  ;;  %741 = vmatmul.msk.bf16.gmra.mxu3 %vm352_vm1, %v751_v13 }
  0x9a   : > { %v390_v14 = vpop.f32.mrf.mxu0  ;;  %v400_v15 = vpop.f32.mrf.mxu1 }
  0x9b   : > { %v478_v29 = vmul.f32 %v390_v14, %v390_v14  ;;  %v482_v43 = vmul.f32 %v400_v15, %v400_v15 }
  0xa1   : > { %v410_v16 = vpop.f32.mrf.mxu2  ;;  %v929_v17 = vpop.f32.mrf.mxu3 }
  0xa2   : > { %v392_v18 = vpop.f32.mrf.mxu0  ;;  %v402_v19 = vpop.f32.mrf.mxu1  ;;  %v486_v59 = vmul.f32 %v410_v16, %v410_v16  ;;  %v490_v7 = vmul.f32 %v929_v17, %v929_v17 }
  0xa3   : > { %v757_v20 = vpack.c.bf16 %v392_v18, %v390_v14  ;;  %v767_v21 = vpack.c.bf16 %v402_v19, %v400_v15  ;;  %v479_v28 = vmul.f32 %v392_v18, %v392_v18  ;;  %v462_v31 = vadd.f32 %v392_v18, %v390_v14 }
  0xa4   : > { %v483_v46 = vmul.f32 %v402_v19, %v402_v19 }
  0xa5   : > { %758 = vst [vmem:[%s936_s6] sm:$0xff] %v757_v20   ;;  %v494_v32 = vadd.f32 %v479_v28, %v478_v29 }
  0xa6   : > { %795 = vst [vmem:[%s936_s6 + $0x10] sm:$0xff] %v767_v21  }
  0xa9   : > { %v412_v22 = vpop.f32.mrf.mxu2  ;;  %v422_v23 = vpop.f32.mrf.mxu3 }
  0xaa   : > { %v395_v24 = vpop.f32.mrf.mxu0  ;;  %v405_v25 = vpop.f32.mrf.mxu1  ;;  %v777_v26 = vpack.c.bf16 %v412_v22, %v410_v16  ;;  %v787_v27 = vpack.c.bf16 %v422_v23, %v929_v17  ;;  %v487_v62 = vmul.f32 %v412_v22, %v412_v22  ;;  %v491_v10 = vmul.f32 %v422_v23, %v422_v23 }
  0xab   : > { %v480_v30 = vmul.f32 %v395_v24, %v395_v24  ;;  %v463_v33 = vadd.f32 %v462_v31, %v395_v24  ;;  %v484_v49 = vmul.f32 %v405_v25, %v405_v25 }
  0xac   : > { %797 = vst [vmem:[%s936_s6 + $0x20] sm:$0xff] %v777_v26  }
  0xad   : > { %799 = vst [vmem:[%s936_s6 + $0x30] sm:$0xff] %v787_v27   ;;  %v495_v36 = vadd.f32 %v494_v32, %v480_v30 }
  0xb1   : > { %v415_v34 = vpop.f32.mrf.mxu2  ;;  %v425_v35 = vpop.f32.mrf.mxu3 }
  0xb2   : > { %v397_v37 = vpop.f32.mrf.mxu0  ;;  %v407_v38 = vpop.f32.mrf.mxu1  ;;  %v488_v2 = vmul.f32 %v415_v34, %v415_v34  ;;  %v492_v14 = vmul.f32 %v425_v35, %v425_v35 }
  0xb3   : > { %v762_v39 = vpack.c.bf16 %v397_v37, %v395_v24  ;;  %v464_v40 = vadd.f32 %v463_v33, %v397_v37  ;;  %v481_v41 = vmul.f32 %v397_v37, %v397_v37  ;;  %v772_v42 = vpack.c.bf16 %v407_v38, %v405_v25 }
  0xb4   : > { %v485_v57 = vmul.f32 %v407_v38, %v407_v38 }
  0xb5   : > { %794 = vst [vmem:[%s936_s6 + $0x8] sm:$0xff] %v762_v39   ;;  %v465_v44 = vadd.f32 %v464_v40, %v400_v15  ;;  %v496_v45 = vadd.f32 %v495_v36, %v481_v41 }
  0xb6   : > { %796 = vst [vmem:[%s936_s6 + $0x18] sm:$0xff] %v772_v42  }
  0xb7   : > { %v497_v47 = vadd.f32 %v496_v45, %v482_v43  ;;  %v466_v48 = vadd.f32 %v465_v44, %v402_v19 }
  0xb9   : > { %v467_v50 = vadd.f32 %v466_v48, %v405_v25  ;;  %v498_v51 = vadd.f32 %v497_v47, %v483_v46  ;;  %v417_v52 = vpop.f32.mrf.mxu2  ;;  %v427_v53 = vpop.f32.mrf.mxu3 }
  0xba   : > { %v782_v54 = vpack.c.bf16 %v417_v52, %v415_v34  ;;  %v792_v55 = vpack.c.bf16 %v427_v53, %v425_v35  ;;  %v489_v6 = vmul.f32 %v417_v52, %v417_v52  ;;  %v493_v19 = vmul.f32 %v427_v53, %v427_v53 }
  0xbb   : > { %v468_v56 = vadd.f32 %v467_v50, %v407_v38  ;;  %v499_v58 = vadd.f32 %v498_v51, %v484_v49 }
  0xbc   : > { %798 = vst [vmem:[%s936_s6 + $0x28] sm:$0xff] %v782_v54  }
  0xbd   : > { %v469_v60 = vadd.f32 %v468_v56, %v410_v16  ;;  %v500_v61 = vadd.f32 %v499_v58, %v485_v57  ;;  %800 = vst [vmem:[%s936_s6 + $0x38] sm:$0xff] %v792_v55  }
  0xbf   : > { %v501_v63 = vadd.f32 %v500_v61, %v486_v59  ;;  %v470_v0 = vadd.f32 %v469_v60, %v412_v22 }
  0xc1   : > { %v471_v1 = vadd.f32 %v470_v0, %v415_v34  ;;  %v502_v3 = vadd.f32 %v501_v63, %v487_v62 }
  0xc3   : > { %v503_v4 = vadd.f32 %v502_v3, %v488_v2  ;;  %v472_v5 = vadd.f32 %v471_v1, %v417_v52 }
  0xc5   : > { %v473_v8 = vadd.f32 %v472_v5, %v929_v17  ;;  %v504_v9 = vadd.f32 %v503_v4, %v489_v6 }
  0xc7   : > { %v505_v11 = vadd.f32 %v504_v9, %v490_v7  ;;  %v474_v12 = vadd.f32 %v473_v8, %v422_v23 }
  0xc9   : > { %v475_v13 = vadd.f32 %v474_v12, %v425_v35  ;;  %v506_v15 = vadd.f32 %v505_v11, %v491_v10 }
  0xcb   : > { %v507_v16 = vadd.f32 %v506_v15, %v492_v14  ;;  %v476_v18 = vadd.f32 %v475_v13, %v427_v53 }
  0xcd   : > { %477 = vst [vmem:[%s267_s10] sm:$0xff] %v476_v18  ;;  %v508_v17 = vadd.f32 %v507_v16, %v493_v19 }
  0xcf   : > { %509 = vst [vmem:[%s274_s13] sm:$0xff] %v508_v17 }
  0xd0 PF: > { %s15_s17 = sadd.s32 1, %s856_s17   ;;  %s972_s15 = smov %s852_s16 }
  0xd1   : > { %p12_p6 = scmp.ge.s32.totalorder %s15_s17, 6   ;;  %s973_s16 = smov %s975_s18 }
  0xd3   :  { %14 = sbr.rel (!%p12_p6) target bundleno = 2 (0x2), region = 85 }

</bundles_post_ra>
